<compile_context>
chip_gen: v7x
topology: tpu7x:2x2x1
jax: 0.10.0
libtpu: 0.0.40
codegen_flags: <defaults>
</compile_context>

<pallas_src>
import functools

import jax
import jax.numpy as jnp
from jax.experimental import pallas as pl
from jax.experimental.pallas import tpu as pltpu


def _rmsnorm_kernel(x_ref, w_ref, o_ref, *, eps: float, inv_dim: float):
    # x_ref: (TM, Dp) input rows; w_ref: (1, Dp) weight; o_ref: (TM, Dp).
    # All math in f32.  The cross-lane sum goes to the XLU and rsqrt to the
    # EUP, so neither competes with the VPU elementwise work -> the whole
    # kernel hides under the HBM load/store time.
    x = x_ref[...].astype(jnp.float32)
    # 1/dim is a compile-time constant multiply (not a per-row divide).
    # Zero-padded lanes contribute 0 to the sum; inv_dim uses the true dim.
    mean_sq = jnp.sum(x * x, axis=-1, keepdims=True) * inv_dim + eps
    inv = jax.lax.rsqrt(mean_sq)
    w = w_ref[...].astype(jnp.float32)
    o_ref[...] = ((x * inv) * (1.0 + w)).astype(o_ref.dtype)


def gemma_rms_norm(x: jax.Array, weight: jax.Array, eps: float = 1e-6,
                   out_dtype=None) -> jax.Array:
    """RMSNorm over the last axis. x: (..., dim), weight: (dim,)."""
    if out_dtype is None:
        out_dtype = jnp.float32  # matches the reference module exactly
    orig_shape = x.shape
    dim = orig_shape[-1]
    rows = 1
    for s in orig_shape[:-1]:
        rows *= s
    rows = max(rows, 1)

    x2d = x.reshape(rows, dim)

    # --- Lane padding: keep the last dim a multiple of 128 so stores are
    # unmasked full-lane vst's.  This is a no-op (no pad/slice copies) for
    # real Gemma hidden sizes (2048 / 3072 / 4096 ...).
    dim_p = ((dim + 127) // 128) * 128
    if dim_p != dim:
        x2d = jnp.pad(x2d, ((0, 0), (0, dim_p - dim)))
        w_p = jnp.pad(weight, (0, dim_p - dim))
    else:
        w_p = weight
    w2d = w_p.reshape(1, dim_p)

    # --- Row tile: as large as possible while keeping the double-buffered
    # (input tile + output tile) footprint under ~32 MiB.  That fits every
    # generation's VMEM (v5e/v6e 128 MiB, v7x 64 MiB) with headroom, and is
    # large enough (hundreds of rows for dim 2048-4096) to amortize the
    # ~0.35 us per-grid-step overhead and keep DMAs long.
    in_isz = jnp.dtype(x.dtype).itemsize
    out_isz = jnp.dtype(out_dtype).itemsize
    w_isz = jnp.dtype(w_p.dtype).itemsize
    tile_budget = 32 * 1024 * 1024
    per_row_bytes = 2 * dim_p * (in_isz + out_isz)  # double-buffered in + out
    tm = tile_budget // per_row_bytes
    tm = max(8, min(2048, (tm // 8) * 8))
    if rows <= tm:
        tm = rows  # single full block; full-array dims are always legal
    grid = (pl.cdiv(rows, tm),)

    # Explicit scoped-VMEM limit sized to the actual buffers (+ headroom),
    # so the large tile compiles under every generation's default limit
    # while staying well inside v7x's 64 MiB physical VMEM.
    tile_bytes = 2 * tm * dim_p * (in_isz + out_isz)
    w_bytes = 2 * dim_p * w_isz
    vmem_limit = max(int(tile_bytes + w_bytes + (4 << 20)), 32 * 1024 * 1024)

    out2d = pl.pallas_call(
        functools.partial(_rmsnorm_kernel, eps=eps, inv_dim=1.0 / dim),
        out_shape=jax.ShapeDtypeStruct((rows, dim_p), out_dtype),
        grid_spec=pltpu.PrefetchScalarGridSpec(
            num_scalar_prefetch=0,
            grid=grid,
            in_specs=[
                pl.BlockSpec((tm, dim_p), lambda i: (i, 0)),  # input row tile
                pl.BlockSpec((1, dim_p), lambda i: (0, 0)),   # weight, stays resident
            ],
            out_specs=pl.BlockSpec((tm, dim_p), lambda i: (i, 0)),
        ),
        compiler_params=pltpu.CompilerParams(
            dimension_semantics=("parallel",),  # row axis shards across TCs (v7x)
            vmem_limit_bytes=vmem_limit,
        ),
    )(x2d, w2d)

    if dim_p != dim:
        out2d = out2d[:, :dim]
    return out2d.reshape(orig_shape)


def _reference(x, weight, eps=1e-6):
    x32 = x.astype(jnp.float32)
    ms = jnp.mean(x32 * x32, axis=-1, keepdims=True) + eps
    return (x32 * jax.lax.rsqrt(ms)) * (1.0 + weight.astype(jnp.float32))


if __name__ == "__main__":
    # Small shapes consistent with the module: batch=2, seq=8, hidden(dim)=32
    B, S, D = 2, 8, 32
    key = jax.random.PRNGKey(0)
    kx, kw = jax.random.split(key)

    x = jax.random.normal(kx, (B, S, D), dtype=jnp.float32)
    # Module initializes weight to zeros; use small random values so the
    # (1 + weight) scaling path is actually exercised.
    weight = 0.1 * jax.random.normal(kw, (D,), dtype=jnp.float32)

    out = gemma_rms_norm(x, weight, eps=1e-6)
    out = jax.block_until_ready(out)

    ref = _reference(x, weight, eps=1e-6)
    assert out.shape == (B, S, D)
    assert out.dtype == jnp.float32
    assert jnp.allclose(out, ref, atol=1e-5, rtol=1e-5), "mismatch vs reference"

    # Also exercise a non-multiple-of-8 row count and bf16-in / bf16-out path.
    x2 = jax.random.normal(kx, (3, 11, D), dtype=jnp.bfloat16)
    out2 = jax.block_until_ready(gemma_rms_norm(x2, weight, out_dtype=jnp.bfloat16))
    ref2 = _reference(x2, weight).astype(jnp.bfloat16)
    assert out2.dtype == jnp.bfloat16
    assert jnp.allclose(out2.astype(jnp.float32), ref2.astype(jnp.float32),
                        atol=2e-2, rtol=2e-2), "bf16 mismatch vs reference"

    # A 128-aligned hidden size (real Gemma-style dim), f32 out like the module.
    x3 = jax.random.normal(kx, (4, 16, 256), dtype=jnp.bfloat16)
    w3 = 0.1 * jax.random.normal(kw, (256,), dtype=jnp.float32)
    out3 = jax.block_until_ready(gemma_rms_norm(x3, w3))
    ref3 = _reference(x3, w3)
    assert out3.dtype == jnp.float32
    assert jnp.allclose(out3, ref3, atol=2e-2, rtol=2e-2), "aligned-dim mismatch"

    print("KERNEL_OK")
</pallas_src>

<mosaic_0001>
module attributes {stable_mosaic.version = 11 : i64} {
  func.func @_rmsnorm_kernel(%arg0: i32, %arg1: memref<16x128xf32, #tpu.memory_space<vmem>>, %arg2: memref<1x128xf32, #tpu.memory_space<vmem>>, %arg3: memref<16x128xf32, #tpu.memory_space<vmem>>) attributes {dimension_semantics = [#tpu.dimension_semantics<parallel>], iteration_bounds = array<i64: 1>, scalar_prefetch = 0 : i64, scratch_operands = 0 : i64, tpu.core_type = #tpu.core_type<tc>, window_params = [{transform_indices = @transform_0, window_bounds = array<i64: 16, 128>}, {pipeline_mode = #tpu.pipeline_mode<synchronous>, transform_indices = @transform_1, window_bounds = array<i64: 1, 128>}, {transform_indices = @transform_2, window_bounds = array<i64: 16, 128>}]} {
    %c0 = arith.constant 0 : index
    %c0_0 = arith.constant 0 : index
    %0 = vector.load %arg1[%c0, %c0_0] : memref<16x128xf32, #tpu.memory_space<vmem>>, vector<16x128xf32>
    %1 = arith.mulf %0, %0 : vector<16x128xf32>
    %cst = arith.constant dense<0.000000e+00> : vector<16xf32>
    %2 = vector.multi_reduction <add>, %1, %cst [1] : vector<16x128xf32> to vector<16xf32>
    %3 = vector.shape_cast %2 : vector<16xf32> to vector<16x1xf32>
    %cst_1 = arith.constant 3.125000e-02 : f32
    %4 = vector.broadcast %cst_1 : f32 to vector<16x1xf32>
    %5 = arith.mulf %3, %4 : vector<16x1xf32>
    %cst_2 = arith.constant 9.99999997E-7 : f32
    %6 = vector.broadcast %cst_2 : f32 to vector<16x1xf32>
    %7 = arith.addf %5, %6 : vector<16x1xf32>
    %8 = math.rsqrt %7 : vector<16x1xf32>
    %c0_3 = arith.constant 0 : index
    %c0_4 = arith.constant 0 : index
    %9 = vector.load %arg2[%c0_3, %c0_4] : memref<1x128xf32, #tpu.memory_space<vmem>>, vector<1x128xf32>
    %10 = vector.broadcast %8 : vector<16x1xf32> to vector<16x128xf32>
    %11 = arith.mulf %0, %10 : vector<16x128xf32>
    %cst_5 = arith.constant 1.000000e+00 : f32
    %12 = vector.broadcast %cst_5 : f32 to vector<1x128xf32>
    %13 = arith.addf %12, %9 : vector<1x128xf32>
    %14 = vector.broadcast %13 : vector<1x128xf32> to vector<16x128xf32>
    %15 = arith.mulf %11, %14 : vector<16x128xf32>
    %c0_6 = arith.constant 0 : index
    %c0_7 = arith.constant 0 : index
    %16 = vector.load %arg3[%c0_6, %c0_7] : memref<16x128xf32, #tpu.memory_space<vmem>>, vector<16x128xf32>
    tpu.vector_store %arg3[%c0_6, %c0_7], %15 {strides = array<i32>} : memref<16x128xf32, #tpu.memory_space<vmem>>, vector<16x128xf32>,
    return
  }
  func.func @transform_0(%arg0: i32) -> (i32, i32) {
    %c0_i32 = arith.constant 0 : i32
    %c0_i32_0 = arith.constant 0 : i32
    return %arg0, %c0_i32 : i32, i32
  }
  func.func @transform_1(%arg0: i32) -> (i32, i32) {
    %c0_i32 = arith.constant 0 : i32
    %c0_i32_0 = arith.constant 0 : i32
    %c0_i32_1 = arith.constant 0 : i32
    return %c0_i32, %c0_i32_0 : i32, i32
  }
  func.func @transform_2(%arg0: i32) -> (i32, i32) {
    %c0_i32 = arith.constant 0 : i32
    %c0_i32_0 = arith.constant 0 : i32
    return %arg0, %c0_i32 : i32, i32
  }
}

</mosaic_0001>

<bundles_post_ra>
// kernel: tpu_custom_call.1
= control target key start
LH: loop header
LB: loop body
LE: loop exit
PB: predicated region body
PF: predicated region fallthrough
CT: control target
= control target key end

     0   :  { %7 = vsyncpa [#allocation3], 0  ;;  %s179_s0 = inlined_call_operand.hbm [shape: f32[16,128], index: 0, kind: input, shape index: {}]   ;;  %s180_s1 = inlined_call_operand.vmem [shape: f32[1,128], index: 1, kind: input, shape index: {}]   ;;  %s181_s2 = inlined_call_operand.hbm [shape: f32[16,128], index: 2, kind: output, shape index: {}]  }
   0x1   :  { %8 = vsyncpa [#allocation4], 0  ;;  %s127_s9 = smov [#allocation2]   ;;  %s79_s13 = scalar_lea.hbm %s179_s0, 256 }
   0x2   :  { %s14_s10 = sshll.u32 %s127_s9, 4  ;;  %p80_p0 = scmp.ne.s32.totalorder %s179_s0, %s79_s13  ;;  %s15_s10 = int_to_ptr.vmem [resolvable:$true] %s14_s10 }
   0x3   :  { %p83_p1 = scmp.lt.u32.totalorder %s79_s13, %s179_s0 }
   0x5   :  { %p85_p2 = pnand %p83_p1, %p80_p0 }
   0x7   :  { %88 = shalt.err (!%p85_p2)
}
   0x8   :  { %s89_s18 = scalar_lea.vmem %s15_s10, 256  ;;  %p94_p4 = scmp.lt.s32.totalorder %s15_s10, %s15_s10 }
   0x9   :  { %p90_p3 = scmp.ne.s32.totalorder %s15_s10, %s89_s18  ;;  %p95_p5 = scmp.lt.s32.totalorder %s89_s18, %s89_s18 }
   0xb   :  { %p96_p6 = por %p95_p5, %p94_p4 }
   0xd   :  { %p97_p7 = pnand %p96_p6, %p90_p3 }
   0xf   :  { %100 = shalt.err (!%p97_p7)
}
  0x10   :  { %s128_s19 = smov 128   ;;  %s129_s20 = smov 8  }
  0x11   :  { %20 = dma.hbm_to_vmem [thread:$0]  %s179_s0, 256, %s15_s10, [#allocation3], %s128_s19, %s128_s19, %s129_s20  }
  0x12   :  { %123 = dma.done.wait [#allocation3], 256  }
  0x13   :  { %124 = vsyncadd [#allocation3], 4294967040  ;;  %v26_v0 = vld [vmem:[#allocation2] sm:$0xff]  ;;  %v27_v1 = vld [vmem:[#allocation2 + $0x8] sm:$0xff]  ;;  %v45_v6 = vlaneseq  ;;  %s130_s0 = smov [#allocation5]  }
  0x14   :  { %v28_v2 = vmul.f32 %v26_v0, %v26_v0  ;;  %v29_v3 = vmul.f32 %v27_v1, %v27_v1  ;;  %v40_v12 = vld [vmem:[%s180_s1] sm:$0x1]  ;;  %s59_s25 = sshll.u32 %s130_s0, 4  ;;  %s60_s25 = int_to_ptr.vmem [resolvable:$true] %s59_s25 }
  0x15   :  { %v46_v10 = vshrl.u32 %v45_v6, 7  ;;  %v43_v13 = vadd.f32 1.0, %v40_v12  ;;  %s101_s26 = scalar_lea.vmem %s60_s25, 256  ;;  %p106_p9 = scmp.lt.s32.totalorder %s60_s25, %s60_s25 }
  0x16   :  { %30 = vadd.xlane.f32.xlu0 %v28_v2  ;;  %p102_p8 = scmp.ne.s32.totalorder %s60_s25, %s101_s26  ;;  %p107_p10 = scmp.lt.s32.totalorder %s101_s26, %s101_s26 }
  0x17   :  { %v47_v14 = vsub.s32 0, %v46_v10 }
  0x18   :  { %p108_p11 = por %p107_p10, %p106_p9 }
  0x19   :  { %v48_v15 = vrot.slane %v43_v13, %v47_v14 }
  0x1a   :  { %32 = vadd.xlane.f32.xlu0 %v29_v3  ;;  %p109_p12 = pnand %p108_p11, %p102_p8 }
  0xa3   :  { %v31_v4 = vpop.xlane.xlu0 %30 }
  0xa4   :  { %v34_v5 = vmul.f32 0.03125, %v31_v4 }
  0xa6   :  { %v36_v7 = vadd.f32 1e-06, %v34_v5 }
  0xa7   :  { %v33_v8 = vpop.xlane.xlu0 %32 }
  0xa8   :  { %75 = vrsqrt.f32 %v36_v7  ;;  %v35_v9 = vmul.f32 0.03125, %v33_v8 }
  0xaa   :  { %v37_v11 = vadd.f32 1e-06, %v35_v9 }
  0xac   :  { %77 = vrsqrt.f32 %v37_v11 }
  0xb2   :  { %v76_v16 = vpop.eup %75 }
  0xb3   :  { %v41_v17 = vmul.f32 %v76_v16, %v26_v0 }
  0xb5   :  { %v50_v18 = vmul.f32 %v48_v15, %v41_v17 }
  0xb6   :  { %v78_v19 = vpop.eup %77 }
  0xb7   :  { %v42_v20 = vmul.f32 %v78_v19, %v27_v1  ;;  %52 = vst [vmem:[#allocation5] sm:$0xff] %v50_v18 }
  0xb9   :  { %v51_v21 = vmul.f32 %v48_v15, %v42_v20 }
  0xbb   :  { %53 = vst [vmem:[#allocation5 + $0x8] sm:$0xff] %v51_v21 }
  0xbc   :  { %112 = shalt.err (!%p109_p12)
}
  0xbd   :  { %s113_s28 = scalar_lea.hbm %s181_s2, 256 }
  0xbe   :  { %p114_p13 = scmp.ne.s32.totalorder %s181_s2, %s113_s28  ;;  %p117_p0 = scmp.lt.u32.totalorder %s113_s28, %s181_s2 }
  0xc0   :  { %p119_p1 = pnand %p117_p0, %p114_p13 }
  0xc2   :  { %122 = shalt.err (!%p119_p1)
}
  0xc3   :  { %65 = dma.vmem_to_hbm [thread:$0]  %s60_s25, 256, %s181_s2, [#allocation4], %s128_s19, %s128_s19, %s129_s20  }
  0xc4   :  { %125 = dma.done.wait [#allocation4], 256  }
  0xc5   :  { %126 = vsyncadd [#allocation4], 4294967040 }
  0xc6   :  { %69 = vsyncpa [#allocation3], 1 }
  0xc7   :  { %70 = vsyncpa [#allocation4], 1 }

</bundles_post_ra>
